<compile_context>
chip_gen: v7x
topology: tpu7x:2x2x1
jax: 0.10.0
libtpu: 0.0.40
codegen_flags: <defaults>
</compile_context>

<pallas_src>
import jax
import jax.numpy as jnp
from jax import lax
from jax.experimental import pallas as pl
from jax.experimental.pallas import tpu as pltpu


def _ann_leafriver_kernel(b_ref, bln_ref, x0_ref, w_ref, wy_ref, wln_ref,
                          hn_ref, yh_ref, yhs_ref, s_ref):
    """Hoisted-matmul recurrence, everything resident in VMEM/SMEM/vregs.

    b_ref   : (1,)    SMEM  hidden bias (scalar, broadcast over H)
    bln_ref : (1,)    SMEM  output bias (scalar)
    x0_ref  : (B, D)  VMEM  inputs at seq step 0
    w_ref   : (D, H)  VMEM  input->hidden weight
    wy_ref  : (1, H)  VMEM  recurrent (elementwise) weight
    wln_ref : (H, 1)  VMEM  hidden->output weight
    hn_ref  : (B, 1)  VMEM  per-batch-element output
    yh_ref  : (1, H)  VMEM  last pre-activation
    yhs_ref : (1, H)  VMEM  last sigmoid activation
    s_ref   : (B, H)  VMEM scratch: all per-step sigmoid activations
    """
    B = x0_ref.shape[0]
    H = wy_ref.shape[1]

    bias = b_ref[0]        # scalar (SMEM)
    bias_ln = bln_ref[0]   # scalar (SMEM)
    wy = wy_ref[...]       # (1, H)

    # Prologue: one batched MXU matmul instead of B tiny (1,D)@(D,H) matmuls.
    # Kept as a value (register-resident) — no scratch round trip.
    c = bias + jnp.dot(x0_ref[...], w_ref[...],
                       preferred_element_type=jnp.float32)              # (B, H)

    # Serial recurrence over batch elements — VPU + EUP only, fully unrolled
    # with static indices (B is a compile-time constant and small).
    # TODO(synk): for very large B, switch to a lax.fori_loop over a scratch to
    #             bound unrolled code size; trip count here is tiny.
    y_hs = jnp.zeros((1, H), jnp.float32)
    y_h = y_hs
    for t in range(B):
        y_h = c[t:t + 1, :] + y_hs * wy            # VPU mul-add (static slice)
        y_hs = jax.nn.sigmoid(y_h)                 # EUP
        s_ref[t:t + 1, :] = y_hs                   # stash for deferred output proj

    # Epilogue: deferred output projection as one (B,H)@(H,1) matmul + one bulk store.
    hn = bias_ln + jnp.dot(s_ref[...], wln_ref[...],
                           preferred_element_type=jnp.float32)          # (B, 1)
    hn_ref[...] = hn.astype(hn_ref.dtype)
    yh_ref[...] = y_h.astype(yh_ref.dtype)
    yhs_ref[...] = y_hs.astype(yhs_ref.dtype)


def ann_leafriver_sigmoid_qsim(x, weight, weight_y, bias, weight_ln, bias_ln,
                               batch_first=True):
    """JAX/Pallas equivalent of ANN_LeafRiver_Sigmoid_qsim.forward."""
    x = jnp.asarray(x, jnp.float32)
    if not batch_first:
        # module expects (seq, batch, input) when batch_first=False
        x = jnp.transpose(x, (1, 0, 2))
    B = x.shape[0]
    H = weight.shape[1]

    # Only the first sequence step of each batch element is ever read.
    x0 = x[:, 0, :]                                          # (B, D)

    smem = pl.BlockSpec(memory_space=pltpu.MemorySpace.SMEM)
    vmem = pl.BlockSpec(memory_space=pltpu.MemorySpace.VMEM)

    h_n, y_h, y_hs = pl.pallas_call(
        _ann_leafriver_kernel,
        out_shape=(
            jax.ShapeDtypeStruct((B, 1), jnp.float32),
            jax.ShapeDtypeStruct((1, H), jnp.float32),
            jax.ShapeDtypeStruct((1, H), jnp.float32),
        ),
        in_specs=[smem, smem, vmem, vmem, vmem, vmem],
        out_specs=(vmem, vmem, vmem),
        scratch_shapes=[
            pltpu.VMEM((B, H), jnp.float32),   # s_ref: all per-step activations
        ],
    )(
        jnp.asarray(bias, jnp.float32).reshape(1),
        jnp.asarray(bias_ln, jnp.float32).reshape(1),
        x0,
        jnp.asarray(weight, jnp.float32),
        jnp.asarray(weight_y, jnp.float32),
        jnp.asarray(weight_ln, jnp.float32),
    )
    return h_n, y_h, y_hs


def _reference(x, weight, weight_y, bias, weight_ln, bias_ln):
    """Pure-JAX reference mirroring the PyTorch loop (batch_first=True)."""
    x0 = jnp.asarray(x, jnp.float32)[:, 0, :]
    H = weight.shape[1]

    def step(y_hs, xt):
        y_h = bias + xt[None, :] @ weight + y_hs * weight_y
        y_hs_new = jax.nn.sigmoid(y_h)
        y_out = bias_ln + y_hs_new @ weight_ln
        return y_hs_new, (y_out[0, 0], y_h[0], y_hs_new[0])

    y_hs0 = jnp.zeros((1, H), jnp.float32)
    _, (h, y_h_all, y_hs_all) = lax.scan(step, y_hs0, x0)
    return h[:, None], y_h_all[-1][None, :], y_hs_all[-1][None, :]


if __name__ == "__main__":
    key = jax.random.PRNGKey(0)
    kx, kw, kwy, kb, kwln, kbln = jax.random.split(key, 6)

    # small shapes: batch=8, seq=8, input_size=4, hidden_size=32
    B, S, D, H = 8, 8, 4, 32
    x = jax.random.normal(kx, (B, S, D), jnp.float32)

    # deterministic parameter init (torch.rand -> uniform [0,1))
    weight = jax.random.uniform(kw, (D, H), jnp.float32)
    weight_y = jax.random.uniform(kwy, (1, H), jnp.float32)
    bias = jax.random.uniform(kb, (1,), jnp.float32)
    weight_ln = jax.random.uniform(kwln, (H, 1), jnp.float32)
    bias_ln = jax.random.uniform(kbln, (1,), jnp.float32)

    h_n, y_h, y_hs = ann_leafriver_sigmoid_qsim(
        x, weight, weight_y, bias, weight_ln, bias_ln, batch_first=True)
    jax.block_until_ready((h_n, y_h, y_hs))

    assert h_n.shape == (B, 1) and y_h.shape == (1, H) and y_hs.shape == (1, H)

    # correctness check against pure-JAX reference
    h_ref, yh_ref, yhs_ref = _reference(x, weight, weight_y, bias, weight_ln, bias_ln)
    assert jnp.allclose(h_n, h_ref, atol=1e-5, rtol=1e-5)
    assert jnp.allclose(y_h, yh_ref, atol=1e-5, rtol=1e-5)
    assert jnp.allclose(y_hs, yhs_ref, atol=1e-5, rtol=1e-5)

    print("KERNEL_OK")
</pallas_src>

<mosaic_0001>
module attributes {stable_mosaic.version = 11 : i64} {
  func.func @_ann_leafriver_kernel(%arg0: memref<1xf32, #tpu.memory_space<smem>>, %arg1: memref<1xf32, #tpu.memory_space<smem>>, %arg2: memref<8x4xf32, #tpu.memory_space<vmem>>, %arg3: memref<4x32xf32, #tpu.memory_space<vmem>>, %arg4: memref<1x32xf32, #tpu.memory_space<vmem>>, %arg5: memref<32x1xf32, #tpu.memory_space<vmem>>, %arg6: memref<8x1xf32, #tpu.memory_space<vmem>>, %arg7: memref<1x32xf32, #tpu.memory_space<vmem>>, %arg8: memref<1x32xf32, #tpu.memory_space<vmem>>, %arg9: memref<8x32xf32, #tpu.memory_space<vmem>>) attributes {dimension_semantics = [], scalar_prefetch = 0 : i64, scratch_operands = 1 : i64, tpu.core_type = #tpu.core_type<tc>} {
    %c0 = arith.constant 0 : index
    %0 = memref.load %arg0[%c0] : memref<1xf32, #tpu.memory_space<smem>>
    %c0_0 = arith.constant 0 : index
    %1 = memref.load %arg1[%c0_0] : memref<1xf32, #tpu.memory_space<smem>>
    %c0_1 = arith.constant 0 : index
    %c0_2 = arith.constant 0 : index
    %2 = vector.load %arg4[%c0_1, %c0_2] : memref<1x32xf32, #tpu.memory_space<vmem>>, vector<1x32xf32>
    %c0_3 = arith.constant 0 : index
    %c0_4 = arith.constant 0 : index
    %3 = vector.load %arg2[%c0_3, %c0_4] : memref<8x4xf32, #tpu.memory_space<vmem>>, vector<8x4xf32>
    %c0_5 = arith.constant 0 : index
    %c0_6 = arith.constant 0 : index
    %4 = vector.load %arg3[%c0_5, %c0_6] : memref<4x32xf32, #tpu.memory_space<vmem>>, vector<4x32xf32>
    %cst = arith.constant dense<0.000000e+00> : vector<8x32xf32>
    %5 = tpu.matmul %3, %4, %cst {dimension_numbers = #tpu.dot_dimension_numbers<[1], [0], [0], [1], [0, 0, 1, 1], [], []>} : vector<8x4xf32>, vector<4x32xf32>, vector<8x32xf32> -> vector<8x32xf32>
    %6 = vector.broadcast %0 : f32 to vector<8x32xf32>
    %7 = arith.addf %6, %5 : vector<8x32xf32>
    %cst_7 = arith.constant 0.000000e+00 : f32
    %8 = vector.broadcast %cst_7 : f32 to vector<1x32xf32>
    %9 = vector.extract_strided_slice %7 {offsets = [0, 0], sizes = [1, 32], strides = [1, 1]} : vector<8x32xf32> to vector<1x32xf32>
    %10 = arith.mulf %8, %2 : vector<1x32xf32>
    %11 = arith.addf %9, %10 : vector<1x32xf32>
    %12 = arith.negf %11 : vector<1x32xf32>
    %13 = math.exp %12 : vector<1x32xf32>
    %cst_8 = arith.constant 1.000000e+00 : f32
    %14 = vector.broadcast %cst_8 : f32 to vector<1x32xf32>
    %15 = arith.addf %14, %13 : vector<1x32xf32>
    %16 = arith.divf %14, %15 : vector<1x32xf32>
    %c0_9 = arith.constant 0 : index
    %c0_10 = arith.constant 0 : index
    %17 = vector.load %arg9[%c0_9, %c0_10] : memref<8x32xf32, #tpu.memory_space<vmem>>, vector<1x32xf32>
    tpu.vector_store %arg9[%c0_9, %c0_10], %16 {strides = array<i32>} : memref<8x32xf32, #tpu.memory_space<vmem>>, vector<1x32xf32>,
    %18 = vector.extract_strided_slice %7 {offsets = [1, 0], sizes = [1, 32], strides = [1, 1]} : vector<8x32xf32> to vector<1x32xf32>
    %19 = arith.mulf %16, %2 : vector<1x32xf32>
    %20 = arith.addf %18, %19 : vector<1x32xf32>
    %21 = arith.negf %20 : vector<1x32xf32>
    %22 = math.exp %21 : vector<1x32xf32>
    %cst_11 = arith.constant 1.000000e+00 : f32
    %23 = vector.broadcast %cst_11 : f32 to vector<1x32xf32>
    %24 = arith.addf %23, %22 : vector<1x32xf32>
    %25 = arith.divf %23, %24 : vector<1x32xf32>
    %c1 = arith.constant 1 : index
    %c0_12 = arith.constant 0 : index
    %26 = vector.load %arg9[%c1, %c0_12] : memref<8x32xf32, #tpu.memory_space<vmem>>, vector<1x32xf32>
    tpu.vector_store %arg9[%c1, %c0_12], %25 {strides = array<i32>} : memref<8x32xf32, #tpu.memory_space<vmem>>, vector<1x32xf32>,
    %27 = vector.extract_strided_slice %7 {offsets = [2, 0], sizes = [1, 32], strides = [1, 1]} : vector<8x32xf32> to vector<1x32xf32>
    %28 = arith.mulf %25, %2 : vector<1x32xf32>
    %29 = arith.addf %27, %28 : vector<1x32xf32>
    %30 = arith.negf %29 : vector<1x32xf32>
    %31 = math.exp %30 : vector<1x32xf32>
    %cst_13 = arith.constant 1.000000e+00 : f32
    %32 = vector.broadcast %cst_13 : f32 to vector<1x32xf32>
    %33 = arith.addf %32, %31 : vector<1x32xf32>
    %34 = arith.divf %32, %33 : vector<1x32xf32>
    %c2 = arith.constant 2 : index
    %c0_14 = arith.constant 0 : index
    %35 = vector.load %arg9[%c2, %c0_14] : memref<8x32xf32, #tpu.memory_space<vmem>>, vector<1x32xf32>
    tpu.vector_store %arg9[%c2, %c0_14], %34 {strides = array<i32>} : memref<8x32xf32, #tpu.memory_space<vmem>>, vector<1x32xf32>,
    %36 = vector.extract_strided_slice %7 {offsets = [3, 0], sizes = [1, 32], strides = [1, 1]} : vector<8x32xf32> to vector<1x32xf32>
    %37 = arith.mulf %34, %2 : vector<1x32xf32>
    %38 = arith.addf %36, %37 : vector<1x32xf32>
    %39 = arith.negf %38 : vector<1x32xf32>
    %40 = math.exp %39 : vector<1x32xf32>
    %cst_15 = arith.constant 1.000000e+00 : f32
    %41 = vector.broadcast %cst_15 : f32 to vector<1x32xf32>
    %42 = arith.addf %41, %40 : vector<1x32xf32>
    %43 = arith.divf %41, %42 : vector<1x32xf32>
    %c3 = arith.constant 3 : index
    %c0_16 = arith.constant 0 : index
    %44 = vector.load %arg9[%c3, %c0_16] : memref<8x32xf32, #tpu.memory_space<vmem>>, vector<1x32xf32>
    tpu.vector_store %arg9[%c3, %c0_16], %43 {strides = array<i32>} : memref<8x32xf32, #tpu.memory_space<vmem>>, vector<1x32xf32>,
    %45 = vector.extract_strided_slice %7 {offsets = [4, 0], sizes = [1, 32], strides = [1, 1]} : vector<8x32xf32> to vector<1x32xf32>
    %46 = arith.mulf %43, %2 : vector<1x32xf32>
    %47 = arith.addf %45, %46 : vector<1x32xf32>
    %48 = arith.negf %47 : vector<1x32xf32>
    %49 = math.exp %48 : vector<1x32xf32>
    %cst_17 = arith.constant 1.000000e+00 : f32
    %50 = vector.broadcast %cst_17 : f32 to vector<1x32xf32>
    %51 = arith.addf %50, %49 : vector<1x32xf32>
    %52 = arith.divf %50, %51 : vector<1x32xf32>
    %c4 = arith.constant 4 : index
    %c0_18 = arith.constant 0 : index
    %53 = vector.load %arg9[%c4, %c0_18] : memref<8x32xf32, #tpu.memory_space<vmem>>, vector<1x32xf32>
    tpu.vector_store %arg9[%c4, %c0_18], %52 {strides = array<i32>} : memref<8x32xf32, #tpu.memory_space<vmem>>, vector<1x32xf32>,
    %54 = vector.extract_strided_slice %7 {offsets = [5, 0], sizes = [1, 32], strides = [1, 1]} : vector<8x32xf32> to vector<1x32xf32>
    %55 = arith.mulf %52, %2 : vector<1x32xf32>
    %56 = arith.addf %54, %55 : vector<1x32xf32>
    %57 = arith.negf %56 : vector<1x32xf32>
    %58 = math.exp %57 : vector<1x32xf32>
    %cst_19 = arith.constant 1.000000e+00 : f32
    %59 = vector.broadcast %cst_19 : f32 to vector<1x32xf32>
    %60 = arith.addf %59, %58 : vector<1x32xf32>
    %61 = arith.divf %59, %60 : vector<1x32xf32>
    %c5 = arith.constant 5 : index
    %c0_20 = arith.constant 0 : index
    %62 = vector.load %arg9[%c5, %c0_20] : memref<8x32xf32, #tpu.memory_space<vmem>>, vector<1x32xf32>
    tpu.vector_store %arg9[%c5, %c0_20], %61 {strides = array<i32>} : memref<8x32xf32, #tpu.memory_space<vmem>>, vector<1x32xf32>,
    %63 = vector.extract_strided_slice %7 {offsets = [6, 0], sizes = [1, 32], strides = [1, 1]} : vector<8x32xf32> to vector<1x32xf32>
    %64 = arith.mulf %61, %2 : vector<1x32xf32>
    %65 = arith.addf %63, %64 : vector<1x32xf32>
    %66 = arith.negf %65 : vector<1x32xf32>
    %67 = math.exp %66 : vector<1x32xf32>
    %cst_21 = arith.constant 1.000000e+00 : f32
    %68 = vector.broadcast %cst_21 : f32 to vector<1x32xf32>
    %69 = arith.addf %68, %67 : vector<1x32xf32>
    %70 = arith.divf %68, %69 : vector<1x32xf32>
    %c6 = arith.constant 6 : index
    %c0_22 = arith.constant 0 : index
    %71 = vector.load %arg9[%c6, %c0_22] : memref<8x32xf32, #tpu.memory_space<vmem>>, vector<1x32xf32>
    tpu.vector_store %arg9[%c6, %c0_22], %70 {strides = array<i32>} : memref<8x32xf32, #tpu.memory_space<vmem>>, vector<1x32xf32>,
    %72 = vector.extract_strided_slice %7 {offsets = [7, 0], sizes = [1, 32], strides = [1, 1]} : vector<8x32xf32> to vector<1x32xf32>
    %73 = arith.mulf %70, %2 : vector<1x32xf32>
    %74 = arith.addf %72, %73 : vector<1x32xf32>
    %75 = arith.negf %74 : vector<1x32xf32>
    %76 = math.exp %75 : vector<1x32xf32>
    %cst_23 = arith.constant 1.000000e+00 : f32
    %77 = vector.broadcast %cst_23 : f32 to vector<1x32xf32>
    %78 = arith.addf %77, %76 : vector<1x32xf32>
    %79 = arith.divf %77, %78 : vector<1x32xf32>
    %c7 = arith.constant 7 : index
    %c0_24 = arith.constant 0 : index
    %80 = vector.load %arg9[%c7, %c0_24] : memref<8x32xf32, #tpu.memory_space<vmem>>, vector<1x32xf32>
    tpu.vector_store %arg9[%c7, %c0_24], %79 {strides = array<i32>} : memref<8x32xf32, #tpu.memory_space<vmem>>, vector<1x32xf32>,
    %c0_25 = arith.constant 0 : index
    %c0_26 = arith.constant 0 : index
    %81 = vector.load %arg9[%c0_25, %c0_26] : memref<8x32xf32, #tpu.memory_space<vmem>>, vector<8x32xf32>
    %c0_27 = arith.constant 0 : index
    %c0_28 = arith.constant 0 : index
    %82 = vector.load %arg5[%c0_27, %c0_28] : memref<32x1xf32, #tpu.memory_space<vmem>>, vector<32x1xf32>
    %cst_29 = arith.constant dense<0.000000e+00> : vector<8x1xf32>
    %83 = tpu.matmul %81, %82, %cst_29 {dimension_numbers = #tpu.dot_dimension_numbers<[1], [0], [0], [1], [0, 0, 1, 1], [], []>} : vector<8x32xf32>, vector<32x1xf32>, vector<8x1xf32> -> vector<8x1xf32>
    %84 = vector.broadcast %1 : f32 to vector<8x1xf32>
    %85 = arith.addf %84, %83 : vector<8x1xf32>
    %c0_30 = arith.constant 0 : index
    %c0_31 = arith.constant 0 : index
    %86 = vector.load %arg6[%c0_30, %c0_31] : memref<8x1xf32, #tpu.memory_space<vmem>>, vector<8x1xf32>
    tpu.vector_store %arg6[%c0_30, %c0_31], %85 {strides = array<i32>} : memref<8x1xf32, #tpu.memory_space<vmem>>, vector<8x1xf32>,
    %c0_32 = arith.constant 0 : index
    %c0_33 = arith.constant 0 : index
    %87 = vector.load %arg7[%c0_32, %c0_33] : memref<1x32xf32, #tpu.memory_space<vmem>>, vector<1x32xf32>
    tpu.vector_store %arg7[%c0_32, %c0_33], %74 {strides = array<i32>} : memref<1x32xf32, #tpu.memory_space<vmem>>, vector<1x32xf32>,
    %c0_34 = arith.constant 0 : index
    %c0_35 = arith.constant 0 : index
    %88 = vector.load %arg8[%c0_34, %c0_35] : memref<1x32xf32, #tpu.memory_space<vmem>>, vector<1x32xf32>
    tpu.vector_store %arg8[%c0_34, %c0_35], %79 {strides = array<i32>} : memref<1x32xf32, #tpu.memory_space<vmem>>, vector<1x32xf32>,
    return
  }
}

</mosaic_0001>

<bundles_post_ra>
// kernel: tpu_custom_call.1
= control target key start
LH: loop header
LB: loop body
LE: loop exit
PB: predicated region body
PF: predicated region fallthrough
CT: control target
= control target key end

     0   :  { %16 = vsyncpa [#allocation6], 0  ;;  %vm39_vm0 = vcmask 1043456   ;;  %v464_v2 = vmov 0.0   ;;  %vm465_vm1 = vmmov 0   ;;  %vm35_vm2 = vcmask 31744   ;;  %s586_s0 = inlined_call_operand.<no memory space> [shape: f32[1], index: 0, kind: input, shape index: {}]   ;;  %s587_s1 = inlined_call_operand.<no memory space> [shape: f32[1], index: 1, kind: input, shape index: {}]   ;;  %s588_s2 = inlined_call_operand.vmem [shape: f32[8,4], index: 2, kind: input, shape index: {}]   ;;  %s589_s3 = inlined_call_operand.vmem [shape: f32[4,32], index: 3, kind: input, shape index: {}]   ;;  %s590_s4 = inlined_call_operand.vmem [shape: f32[1,32], index: 4, kind: input, shape index: {}]   ;;  %s591_s5 = inlined_call_operand.vmem [shape: f32[32,1], index: 5, kind: input, shape index: {}]   ;;  %s592_s6 = inlined_call_operand.vmem [shape: f32[8,1], index: 6, kind: output, shape index: {0}]   ;;  %s593_s7 = inlined_call_operand.hbm [shape: f32[1,32], index: 7, kind: output, shape index: {1}]   ;;  %s594_s8 = inlined_call_operand.hbm [shape: f32[1,32], index: 8, kind: output, shape index: {2}]  }
   0x1   :  { %v34_v0 = vld [vmem:[%s589_s3] sm:$0xf]  ;;  %357 = vmatprep.subr.mxu0 %v464_v2  ;;  %359 = vmatprep.mubr.msk.f32.mxu0 %vm465_vm1, %v464_v2 }
   0x2   :  { %v33_v1 = vld [vmem:[%s588_s2] sm:$0xff] }
   0x3   :  { %17 = vsyncpa [#allocation8], 0  ;;  %358 = vmatpush3.msk.msra.mxu0 %vm39_vm0, %v34_v0  ;;  %370 = vmatprep.mubr.msk.f32.mxu1 %vm465_vm1, %v464_v2  ;;  %v32_v3 = vld [vmem:[%s590_s4] sm:$0x1]  ;;  %v113_v4 = vstv %s586_s0  ;;  %vm123_vm3 = vcmask 253952   ;;  %v139_v18 = vlaneseq  ;;  %vm136_vm4 = vcmask 254977  }
   0x4   :  { %360 = vmatmul.mubr.msk.f32.vlgmr.msra.gmra.mrb[0].mxu0 %vm35_vm2, %v33_v1  ;;  %v115_v5 = vmul.f32 0.0, %v32_v3  ;;  %vm155_vm5 = vcmask 256002   ;;  %v223_v38 = vld [vmem:[%s591_s5] sm:$0xff]  ;;  %v224_v39 = vld [vmem:[%s591_s5 + $0x8] sm:$0xff]  ;;  %v225_v40 = vld [vmem:[%s591_s5 + $0x10] sm:$0xff]  ;;  %v466_v41 = vmov 0.0|0.0  }
   0x5   :  { %v140_v21 = vshrl.u32 %v139_v18, 7  ;;  %373 = vmatprep.subr.bf16.mxu1 %v466_v41  ;;  %v374_v42 = vpack.c.bf16 %v224_v39, %v223_v38  ;;  %v226_v43 = vld [vmem:[%s591_s5 + $0x18] sm:$0xff]  ;;  %vm168_vm6 = vcmask 257027   ;;  %vm181_vm7 = vcmask 258052   ;;  %s467_s5 = smov [#allocation5]   ;;  %s468_s18 = smov [#allocation7]  }
   0x6   :  { %v377_v44 = vpack.c.bf16 %v226_v43, %v225_v40  ;;  %vm194_vm8 = vcmask 259077   ;;  %vm207_vm9 = vcmask 260102   ;;  %vm220_vm10 = vcmask 261127   ;;  %s315_s17 = sshll.u32 %s467_s5, 4  ;;  %s325_s19 = sshll.u32 %s468_s18, 4  ;;  %s316_s17 = int_to_ptr.vmem [resolvable:$true] %s315_s17  ;;  %s326_s19 = int_to_ptr.vmem [resolvable:$true] %s325_s19 }
   0x7   :  { %v141_v22 = vsub.s32 0, %v140_v21  ;;  %375 = vmatpush3.bf16.msra.mxu1 %v374_v42  ;;  %vm227_vm11 = vcmask 261120   ;;  %s416_s20 = scalar_lea.vmem %s316_s17, 16  ;;  %s420_s21 = scalar_lea.vmem %s316_s17, 32 }
   0x8   :  { %376 = vmatprep.subr.bf16.mxu1 %v466_v41  ;;  %p417_p0 = scmp.ne.s32.totalorder %s316_s17, %s416_s20  ;;  %p421_p1 = scmp.lt.s32.totalorder %s316_s17, %s316_s17 }
   0x9   :  { %v530_v23 = vrot.slane %v32_v3, %v141_v22  ;;  %p422_p2 = scmp.lt.s32.totalorder %s420_s21, %s416_s20 }
   0xb   :  { %378 = vmatpush3.bf16.msra.mxu1 %v377_v44  ;;  %p423_p3 = por %p422_p2, %p421_p1 }
   0xd   :  { %p424_p4 = pnand %p423_p3, %p417_p0 }
  0xd7   :  { %v109_v6 = vpop.f32.mrb[0].mxu0 }
  0xd8   :  { %v526_v7 = vadd.f32 %v113_v4, %v109_v6  ;;  %v361_v8 = vpop.f32.mrb[1].mxu0 }
  0xda   :  { %v116_v9 = vadd.f32 %v115_v5, %v526_v7 }
  0xdc   :  { %v341_v10 = vmul.f32 -1.442695, %v116_v9 }
  0xde   :  { %384 = vpow2.f32 %v341_v10 }
  0xe8   :  { %v385_v11 = vpop.eup %384 }
  0xe9   :  { %v120_v12 = vadd.f32 1.0, %v385_v11 }
  0xeb   :  { %386 = vrcp.f32 %v120_v12 }
  0xf5   :  { %v387_v13 = vpop.eup %386 }
  0xf6   :  { %v125_v14 = vmul.f32 %v387_v13, %v32_v3  ;;  %124 = vst.msk [vmem:[#allocation2] sm:$0x1] %vm123_vm3, %v387_v13 }
  0xf8   :  { %v127_v15 = vrot.slane %v125_v14, 7 }
  0xfa   :  { %v129_v16 = vadd.f32 %v127_v15, %v526_v7 }
  0xfc   :  { %v342_v17 = vmul.f32 -1.442695, %v129_v16 }
  0xfe   :  { %388 = vpow2.f32 %v342_v17 }
 0x108   :  { %v389_v19 = vpop.eup %388 }
 0x109   :  { %v133_v20 = vadd.f32 1.0, %v389_v19 }
 0x10b   :  { %390 = vrcp.f32 %v133_v20 }
 0x115   :  { %v391_v24 = vpop.eup %390 }
 0x116   :  { %v144_v25 = vmul.f32 %v391_v24, %v530_v23  ;;  %137 = vst.msk [vmem:[#allocation2] sm:$0x2] %vm136_vm4, %v391_v24 }
 0x118   :  { %v146_v26 = vrot.slane %v144_v25, 7 }
 0x11a   :  { %v148_v27 = vadd.f32 %v146_v26, %v526_v7 }
 0x11c   :  { %v343_v28 = vmul.f32 -1.442695, %v148_v27 }
 0x11e   :  { %392 = vpow2.f32 %v343_v28 }
 0x128   :  { %v393_v29 = vpop.eup %392 }
 0x129   :  { %v152_v30 = vadd.f32 1.0, %v393_v29 }
 0x12b   :  { %394 = vrcp.f32 %v152_v30 }
 0x135   :  { %v395_v31 = vpop.eup %394 }
 0x136   :  { %v157_v32 = vmul.f32 %v395_v31, %v530_v23  ;;  %156 = vst.msk [vmem:[#allocation2] sm:$0x4] %vm155_vm5, %v395_v31 }
 0x138   :  { %v159_v33 = vrot.slane %v157_v32, 7 }
 0x13a   :  { %v161_v34 = vadd.f32 %v159_v33, %v526_v7 }
 0x13c   :  { %v344_v35 = vmul.f32 -1.442695, %v161_v34 }
 0x13e   :  { %396 = vpow2.f32 %v344_v35 }
 0x148   :  { %v397_v36 = vpop.eup %396 }
 0x149   :  { %v165_v37 = vadd.f32 1.0, %v397_v36 }
 0x14b   :  { %398 = vrcp.f32 %v165_v37 }
 0x155   :  { %v399_v45 = vpop.eup %398 }
 0x156   :  { %v170_v46 = vmul.f32 %v399_v45, %v530_v23  ;;  %169 = vst.msk [vmem:[#allocation2] sm:$0x8] %vm168_vm6, %v399_v45 }
 0x158   :  { %v172_v47 = vrot.slane %v170_v46, 7 }
 0x15a   :  { %v174_v48 = vadd.f32 %v172_v47, %v526_v7 }
 0x15c   :  { %v345_v49 = vmul.f32 -1.442695, %v174_v48 }
 0x15e   :  { %400 = vpow2.f32 %v345_v49 }
 0x168   :  { %v401_v50 = vpop.eup %400 }
 0x169   :  { %v178_v51 = vadd.f32 1.0, %v401_v50 }
 0x16b   :  { %402 = vrcp.f32 %v178_v51 }
 0x175   :  { %v403_v52 = vpop.eup %402 }
 0x176   :  { %v183_v53 = vmul.f32 %v403_v52, %v530_v23  ;;  %182 = vst.msk [vmem:[#allocation2] sm:$0x10] %vm181_vm7, %v403_v52 }
 0x178   :  { %v185_v54 = vrot.slane %v183_v53, 7 }
 0x17a   :  { %v187_v55 = vadd.f32 %v185_v54, %v526_v7 }
 0x17c   :  { %v346_v56 = vmul.f32 -1.442695, %v187_v55 }
 0x17e   :  { %404 = vpow2.f32 %v346_v56 }
 0x188   :  { %v405_v57 = vpop.eup %404 }
 0x189   :  { %v191_v58 = vadd.f32 1.0, %v405_v57 }
 0x18b   :  { %406 = vrcp.f32 %v191_v58 }
 0x195   :  { %v407_v59 = vpop.eup %406 }
 0x196   :  { %v196_v60 = vmul.f32 %v407_v59, %v530_v23  ;;  %195 = vst.msk [vmem:[#allocation2] sm:$0x20] %vm194_vm8, %v407_v59 }
 0x198   :  { %v198_v61 = vrot.slane %v196_v60, 7 }
 0x19a   :  { %v200_v62 = vadd.f32 %v198_v61, %v526_v7 }
 0x19c   :  { %v347_v63 = vmul.f32 -1.442695, %v200_v62 }
 0x19e   :  { %408 = vpow2.f32 %v347_v63 }
 0x1a8   :  { %v409_v0 = vpop.eup %408 }
 0x1a9   :  { %v204_v1 = vadd.f32 1.0, %v409_v0 }
 0x1ab   :  { %410 = vrcp.f32 %v204_v1 }
 0x1b5   :  { %v411_v2 = vpop.eup %410 }
 0x1b6   :  { %v209_v3 = vmul.f32 %v411_v2, %v530_v23  ;;  %208 = vst.msk [vmem:[#allocation2] sm:$0x40] %vm207_vm9, %v411_v2 }
 0x1b8   :  { %v211_v4 = vrot.slane %v209_v3, 7 }
 0x1ba   :  { %v213_v5 = vadd.f32 %v211_v4, %v526_v7 }
 0x1bc   :  { %v348_v6 = vmul.f32 -1.442695, %v213_v5  ;;  %305 = vst.msk [vmem:[#allocation5 - $0x7] sm:$0x80] %vm220_vm10, %v213_v5 }
 0x1be   :  { %412 = vpow2.f32 %v348_v6 }
 0x1c8   :  { %v413_v8 = vpop.eup %412 }
 0x1c9   :  { %v217_v9 = vadd.f32 1.0, %v413_v8 }
 0x1cb   :  { %414 = vrcp.f32 %v217_v9 }
 0x1d5   :  { %v415_v10 = vpop.eup %414 }
 0x1d6   :  { %221 = vst.msk [vmem:[#allocation2] sm:$0x80] %vm220_vm10, %v415_v10  ;;  %306 = vst.msk [vmem:[#allocation7 - $0x7] sm:$0x80] %vm220_vm10, %v415_v10 }
 0x1dd   :  { %v222_v11 = vld [vmem:[#allocation2] sm:$0xff] }
 0x1de   :  { %371 = vmatmul.mubr.msk.f32.vlgmr.msra.gmra.mrb[0].mxu1 %vm227_vm11, %v222_v11 }
 0x1df   :  { %427 = shalt.err (!%p424_p4)
}
 0x1e0   :  { %s428_s24 = scalar_lea.hbm %s593_s7, 16 }
 0x1e1   :  { %p429_p5 = scmp.ne.s32.totalorder %s593_s7, %s428_s24  ;;  %p432_p6 = scmp.lt.u32.totalorder %s428_s24, %s593_s7 }
 0x1e3   :  { %p434_p7 = pnand %p432_p6, %p429_p5 }
 0x1e5   :  { %437 = shalt.err (!%p434_p7)
}
 0x1e6   :  { %318 = dma.vmem_to_hbm [thread:$0]  %s316_s17, 16, %s593_s7, [#allocation6]  }
 0x1e7   :  { %s438_s9 = scalar_lea.vmem %s326_s19, 16  ;;  %s442_s10 = scalar_lea.vmem %s326_s19, 32 }
 0x1e8   :  { %p439_p8 = scmp.ne.s32.totalorder %s326_s19, %s438_s9  ;;  %p443_p9 = scmp.lt.s32.totalorder %s326_s19, %s326_s19 }
 0x1e9   :  { %p444_p10 = scmp.lt.s32.totalorder %s442_s10, %s438_s9 }
 0x1eb   :  { %p445_p11 = por %p444_p10, %p443_p9 }
 0x1ed   :  { %p446_p12 = pnand %p445_p11, %p439_p8 }
 0x1ef   :  { %449 = shalt.err (!%p446_p12)
}
 0x1f0   :  { %s450_s0 = scalar_lea.hbm %s594_s8, 16 }
 0x1f1   :  { %p451_p13 = scmp.ne.s32.totalorder %s594_s8, %s450_s0  ;;  %p454_p0 = scmp.lt.u32.totalorder %s450_s0, %s594_s8 }
 0x1f3   :  { %p456_p1 = pnand %p454_p0, %p451_p13 }
 0x1f5   :  { %459 = shalt.err (!%p456_p1)
}
 0x1f6   :  { %328 = dma.vmem_to_hbm [thread:$0]  %s326_s19, 16, %s594_s8, [#allocation8]   ;;  %v301_v7 = vstv %s587_s1  ;;  %vm303_vm12 = vcmask 7168  }
 0x2b1   :  { %v297_v12 = vpop.f32.mrb[0].mxu1 }
 0x2b2   :  { %v302_v13 = vadd.f32 %v301_v7, %v297_v12  ;;  %v372_v14 = vpop.f32.mrb[1].mxu1 }
 0x2b4   :  { %304 = vst.msk [vmem:[%s592_s6] sm:$0xff] %vm303_vm12, %v302_v13 }
 0x2b5   :  { %460 = dma.done.wait [#allocation6], 16  }
 0x2b6   :  { %461 = vsyncadd [#allocation6], 4294967280 }
 0x2b7   :  { %462 = dma.done.wait [#allocation8], 16  }
 0x2b8   :  { %463 = vsyncadd [#allocation8], 4294967280 }
 0x2b9   :  { %337 = vsyncpa [#allocation6], 1 }
 0x2ba   :  { %338 = vsyncpa [#allocation8], 1 }

</bundles_post_ra>
